<compile_context>
chip_gen: v6e
topology: v6e:2x2x1
jax: 0.10.0
libtpu: 0.0.40
codegen_flags: <defaults>
</compile_context>

<pallas_src>
import functools

import numpy as np
import jax
import jax.numpy as jnp
from jax.experimental import pallas as pl
from jax.experimental.pallas import tpu as pltpu


# ---------------------------------------------------------------------------
# Fused kernel: masked token mean (skip CLS) + LayerNorm
# ---------------------------------------------------------------------------
def mean_pool_layernorm_kernel(x_ref, gamma_ref, beta_ref, o_ref, acc_ref,
                               *, n_tokens, eps, ragged_tokens):
    t = pl.program_id(1)

    @pl.when(t == 0)
    def _init():
        acc_ref[...] = jnp.zeros_like(acc_ref)

    x = x_ref[...]                                    # [BB, TN, D], input dtype
    bb, tn, _ = x.shape

    if ragged_tokens:
        # Rare path (token axis tiled and N % TN != 0): padding rows of the
        # last block hold stale VMEM.  Force them to exact zeros with a select
        # so NaN/Inf garbage cannot leak through the 0-weight matmul below.
        tok = t * tn + jax.lax.broadcasted_iota(jnp.int32, (1, tn, 1), 1)
        x = jnp.where(tok < n_tokens, x, jnp.zeros_like(x))

    # Per-token 0/1 weights over the GLOBAL token index: drop the CLS token
    # (index 0) and any padding of a ragged last block.  Only O(TN) VPU work.
    idx = t * tn + jax.lax.broadcasted_iota(jnp.int32, (1, 1, tn), 2)
    mask = ((idx >= 1) & (idx < n_tokens)).astype(x.dtype)        # [1, 1, TN]
    maskb = jnp.broadcast_to(mask, (bb, 1, tn))

    # Masked token sum as a batched (1, TN) @ (TN, D) matmul on the otherwise
    # idle MXU; f32 accumulation via preferred_element_type.  HIGHEST keeps the
    # reduction exact for f32 inputs.
    acc_ref[...] += jnp.einsum(
        "bxt,btd->bxd", maskb, x,
        preferred_element_type=jnp.float32,
        precision=jax.lax.Precision.HIGHEST)                      # [BB, 1, D]

    @pl.when(t == pl.num_programs(1) - 1)
    def _finalize():
        pooled = acc_ref[...] * (1.0 / (n_tokens - 1))            # [BB, 1, D]
        mu = jnp.mean(pooled, axis=-1, keepdims=True)
        diff = pooled - mu
        var = jnp.mean(diff * diff, axis=-1, keepdims=True)
        inv = jax.lax.rsqrt(var + eps)
        y = diff * inv * gamma_ref[...] + beta_ref[...]
        o_ref[...] = y.astype(o_ref.dtype)


def _pick_tiles(B, N, D, itemsize, max_tile_bytes):
    """Choose (BB, TN) so one x tile is roughly max_tile_bytes."""
    row_bytes = N * D * itemsize
    if row_bytes > max_tile_bytes:
        # Very long sequences: one batch row per step, tile the token axis
        # with a sublane-aligned block.
        tn = (max_tile_bytes // (D * itemsize)) // 8 * 8
        tn = int(max(8, min(N, tn)))
        return 1, tn
    bb = max(1, max_tile_bytes // row_bytes)
    if bb >= 8:
        bb = (bb // 8) * 8                    # sublane-friendly batch block
    bb = min(bb, B)
    if B >= 2:
        bb = min(bb, pl.cdiv(B, 2))           # >= 2 steps on the parallel axis
    return int(bb), N


def _mean_pool_layernorm(hidden_states, gamma, beta, eps, max_tile_bytes):
    B, N, D = hidden_states.shape
    if N < 2:
        raise ValueError("mean pooling needs at least one patch token (N >= 2)")
    itemsize = jnp.dtype(hidden_states.dtype).itemsize
    BB, TN = _pick_tiles(B, N, D, itemsize, max_tile_bytes)
    grid = (pl.cdiv(B, BB), pl.cdiv(N, TN))
    ragged_tokens = (N % TN) != 0

    kernel = functools.partial(mean_pool_layernorm_kernel,
                               n_tokens=N, eps=float(eps),
                               ragged_tokens=ragged_tokens)

    out = pl.pallas_call(
        kernel,
        out_shape=jax.ShapeDtypeStruct((B, 1, D), hidden_states.dtype),
        grid_spec=pltpu.PrefetchScalarGridSpec(
            num_scalar_prefetch=0,
            grid=grid,
            in_specs=[
                pl.BlockSpec((BB, TN, D), lambda b, t: (b, t, 0)),
                pl.BlockSpec((1, D), lambda b, t: (0, 0)),
                pl.BlockSpec((1, D), lambda b, t: (0, 0)),
            ],
            out_specs=pl.BlockSpec((BB, 1, D), lambda b, t: (b, 0, 0)),
            scratch_shapes=[pltpu.VMEM((BB, 1, D), jnp.float32)],
        ),
        compiler_params=pltpu.CompilerParams(
            dimension_semantics=("parallel", "arbitrary"),
            # ~16 MiB of double-buffered x tiles plus small buffers: above
            # v5e's 16 MiB default scoped limit, comfortably under v7x's
            # 64 MiB physical VMEM.
            vmem_limit_bytes=32 * 1024 * 1024,
        ),
    )(hidden_states, gamma.reshape(1, D), beta.reshape(1, D))
    return out.reshape(B, D)


# ---------------------------------------------------------------------------
# Module wrapper
# ---------------------------------------------------------------------------
def data2vec_vision_pooler(hidden_states, gamma=None, beta=None, *,
                           eps=1e-12, use_mean_pooling=True,
                           max_tile_bytes=8 * 1024 * 1024):
    """Forward pass of Data2VecVisionPooler.

    hidden_states: [B, 1 + num_patches, hidden_size]
    returns:       [B, hidden_size]
    """
    if use_mean_pooling:
        if gamma is None or beta is None:
            raise ValueError("gamma/beta required when use_mean_pooling=True")
        return _mean_pool_layernorm(hidden_states, gamma, beta, eps,
                                    max_tile_bytes)
    # use_mean_pooling=False is a pure slice with zero compute: plain XLA is
    # strictly faster than a per-row Pallas copy kernel (perf-review item).
    return hidden_states[:, 0]


# ---------------------------------------------------------------------------
# Pure numpy reference
# ---------------------------------------------------------------------------
def reference_mean_pool_layernorm(x, gamma, beta, eps):
    x = np.asarray(x, np.float64)
    pooled = x[:, 1:, :].mean(axis=1)
    mu = pooled.mean(axis=-1, keepdims=True)
    var = ((pooled - mu) ** 2).mean(axis=-1, keepdims=True)
    y = (pooled - mu) / np.sqrt(var + eps)
    return y * np.asarray(gamma, np.float64) + np.asarray(beta, np.float64)


if __name__ == "__main__":
    eps = 1e-12                           # Data2VecVisionConfig.layer_norm_eps
    key = jax.random.PRNGKey(0)
    k1, k2, k3, k4 = jax.random.split(key, 4)

    # Case 1: default path (single token block, batch-blocked grid).
    B, N, D = 2, 1 + 16, 32
    x = jax.random.normal(k1, (B, N, D), jnp.float32)
    gamma = 1.0 + 0.1 * jax.random.normal(k2, (D,), jnp.float32)
    beta = 0.1 * jax.random.normal(k3, (D,), jnp.float32)
    out = jax.block_until_ready(
        data2vec_vision_pooler(x, gamma, beta, eps=eps, use_mean_pooling=True))
    ref = reference_mean_pool_layernorm(x, gamma, beta, eps)
    np.testing.assert_allclose(np.asarray(out), ref, rtol=1e-4, atol=1e-5)

    # Case 2: force the token-tiled accumulation path (ragged last block).
    B2, N2, D2 = 2, 1 + 59, 128
    x2 = jax.random.normal(k4, (B2, N2, D2), jnp.float32)
    g2 = jnp.ones((D2,), jnp.float32)
    b2 = jnp.zeros((D2,), jnp.float32)
    out2 = jax.block_until_ready(
        data2vec_vision_pooler(x2, g2, b2, eps=eps, max_tile_bytes=4096))
    ref2 = reference_mean_pool_layernorm(x2, g2, b2, eps)
    np.testing.assert_allclose(np.asarray(out2), ref2, rtol=1e-4, atol=1e-5)

    # Case 3: use_mean_pooling=False (CLS token) path.
    out_cls = jax.block_until_ready(
        data2vec_vision_pooler(x, use_mean_pooling=False))
    np.testing.assert_array_equal(np.asarray(out_cls), np.asarray(x)[:, 0])

    print("KERNEL_OK")
</pallas_src>

<mosaic_0001>
module attributes {stable_mosaic.version = 11 : i64} {
  func.func @mean_pool_layernorm_kernel(%arg0: i32, %arg1: i32, %arg2: memref<1x17x32xf32, #tpu.memory_space<vmem>>, %arg3: memref<1x32xf32, #tpu.memory_space<vmem>>, %arg4: memref<1x32xf32, #tpu.memory_space<vmem>>, %arg5: memref<1x1x32xf32, #tpu.memory_space<vmem>>, %arg6: memref<1x1x32xf32, #tpu.memory_space<vmem>>) attributes {dimension_semantics = [#tpu.dimension_semantics<parallel>, #tpu.dimension_semantics<arbitrary>], iteration_bounds = array<i64: 2, 1>, scalar_prefetch = 0 : i64, scratch_operands = 1 : i64, tpu.core_type = #tpu.core_type<tc>, window_params = [{transform_indices = @transform_0, window_bounds = array<i64: 1, 17, 32>}, {pipeline_mode = #tpu.pipeline_mode<synchronous>, transform_indices = @transform_1, window_bounds = array<i64: 1, 32>}, {pipeline_mode = #tpu.pipeline_mode<synchronous>, transform_indices = @transform_2, window_bounds = array<i64: 1, 32>}, {transform_indices = @transform_3, window_bounds = array<i64: 1, 1, 32>}]} {
    %c0_i32 = arith.constant 0 : i32
    %0 = arith.cmpi eq, %arg1, %c0_i32 : i32
    %1 = arith.extui %0 : i1 to i32
    %c0_i32_0 = arith.constant 0 : i32
    %2 = arith.cmpi ne, %1, %c0_i32_0 : i32
    scf.if %2 {
      %cst_12 = arith.constant 0.000000e+00 : f32
      %22 = vector.broadcast %cst_12 : f32 to vector<1x1x32xf32>
      %c0_13 = arith.constant 0 : index
      %c0_14 = arith.constant 0 : index
      %c0_15 = arith.constant 0 : index
      %23 = vector.load %arg6[%c0_13, %c0_14, %c0_15] : memref<1x1x32xf32, #tpu.memory_space<vmem>>, vector<1x1x32xf32>
      tpu.vector_store %arg6[%c0_13, %c0_14, %c0_15], %22 {strides = array<i32>} : memref<1x1x32xf32, #tpu.memory_space<vmem>>, vector<1x1x32xf32>,
    } else {
    }
    %c0 = arith.constant 0 : index
    %c0_1 = arith.constant 0 : index
    %c0_2 = arith.constant 0 : index
    %3 = vector.load %arg2[%c0, %c0_1, %c0_2] : memref<1x17x32xf32, #tpu.memory_space<vmem>>, vector<1x17x32xf32>
    %c17_i32 = arith.constant 17 : i32
    %4 = arith.muli %arg1, %c17_i32 : i32
    %5 = tpu.iota {dimensions = array<i32: 2>} : vector<1x1x17xi32>
    %6 = vector.broadcast %4 : i32 to vector<1x1x17xi32>
    %7 = arith.addi %6, %5 : vector<1x1x17xi32>
    %c1_i32 = arith.constant 1 : i32
    %8 = vector.broadcast %c1_i32 : i32 to vector<1x1x17xi32>
    %9 = arith.cmpi sge, %7, %8 : vector<1x1x17xi32>
    %c17_i32_3 = arith.constant 17 : i32
    %10 = vector.broadcast %c17_i32_3 : i32 to vector<1x1x17xi32>
    %11 = arith.cmpi slt, %7, %10 : vector<1x1x17xi32>
    %12 = arith.andi %9, %11 : vector<1x1x17xi1>
    %13 = arith.extui %12 : vector<1x1x17xi1> to vector<1x1x17xi32>
    %14 = arith.sitofp %13 : vector<1x1x17xi32> to vector<1x1x17xf32>
    %c0_4 = arith.constant 0 : index
    %c0_5 = arith.constant 0 : index
    %c0_6 = arith.constant 0 : index
    %15 = vector.load %arg6[%c0_4, %c0_5, %c0_6] : memref<1x1x32xf32, #tpu.memory_space<vmem>>, vector<1x1x32xf32>
    "tpu.trace_start"() <{level = 10 : i32, message = "bxt,btd->bxd"}> : () -> ()
    %cst = arith.constant dense<0.000000e+00> : vector<1x1x32xf32>
    %16 = tpu.matmul %14, %3, %cst {dimension_numbers = #tpu.dot_dimension_numbers<[2], [1], [1], [2], [0, 0, 0, 1, 1, 2], [0], [0]>, precision = #tpu.contract_precision<fp32>} : vector<1x1x17xf32>, vector<1x17x32xf32>, vector<1x1x32xf32> -> vector<1x1x32xf32>
    "tpu.trace_stop"() : () -> ()
    %17 = arith.addf %15, %16 : vector<1x1x32xf32>
    %c0_7 = arith.constant 0 : index
    %c0_8 = arith.constant 0 : index
    %c0_9 = arith.constant 0 : index
    %18 = vector.load %arg6[%c0_7, %c0_8, %c0_9] : memref<1x1x32xf32, #tpu.memory_space<vmem>>, vector<1x1x32xf32>
    tpu.vector_store %arg6[%c0_7, %c0_8, %c0_9], %17 {strides = array<i32>} : memref<1x1x32xf32, #tpu.memory_space<vmem>>, vector<1x1x32xf32>,
    %c0_i32_10 = arith.constant 0 : i32
    %19 = arith.cmpi eq, %arg1, %c0_i32_10 : i32
    %20 = arith.extui %19 : i1 to i32
    %c0_i32_11 = arith.constant 0 : i32
    %21 = arith.cmpi ne, %20, %c0_i32_11 : i32
    scf.if %21 {
      %c0_12 = arith.constant 0 : index
      %c0_13 = arith.constant 0 : index
      %c0_14 = arith.constant 0 : index
      %22 = vector.load %arg6[%c0_12, %c0_13, %c0_14] : memref<1x1x32xf32, #tpu.memory_space<vmem>>, vector<1x1x32xf32>
      %cst_15 = arith.constant 6.250000e-02 : f32
      %23 = vector.broadcast %cst_15 : f32 to vector<1x1x32xf32>
      %24 = arith.mulf %22, %23 : vector<1x1x32xf32>
      %cst_16 = arith.constant dense<0.000000e+00> : vector<1x1xf32>
      %25 = vector.multi_reduction <add>, %24, %cst_16 [2] : vector<1x1x32xf32> to vector<1x1xf32>
      %26 = vector.shape_cast %25 : vector<1x1xf32> to vector<1x1x1xf32>
      %cst_17 = arith.constant 3.200000e+01 : f32
      %27 = vector.broadcast %cst_17 : f32 to vector<1x1x1xf32>
      %28 = arith.divf %26, %27 : vector<1x1x1xf32>
      %29 = vector.broadcast %28 : vector<1x1x1xf32> to vector<1x1x32xf32>
      %30 = arith.subf %24, %29 : vector<1x1x32xf32>
      %31 = arith.mulf %30, %30 : vector<1x1x32xf32>
      %cst_18 = arith.constant dense<0.000000e+00> : vector<1x1xf32>
      %32 = vector.multi_reduction <add>, %31, %cst_18 [2] : vector<1x1x32xf32> to vector<1x1xf32>
      %33 = vector.shape_cast %32 : vector<1x1xf32> to vector<1x1x1xf32>
      %cst_19 = arith.constant 3.200000e+01 : f32
      %34 = vector.broadcast %cst_19 : f32 to vector<1x1x1xf32>
      %35 = arith.divf %33, %34 : vector<1x1x1xf32>
      %cst_20 = arith.constant 9.99999996E-13 : f32
      %36 = vector.broadcast %cst_20 : f32 to vector<1x1x1xf32>
      %37 = arith.addf %35, %36 : vector<1x1x1xf32>
      %38 = math.rsqrt %37 : vector<1x1x1xf32>
      %39 = vector.broadcast %38 : vector<1x1x1xf32> to vector<1x1x32xf32>
      %40 = arith.mulf %30, %39 : vector<1x1x32xf32>
      %c0_21 = arith.constant 0 : index
      %c0_22 = arith.constant 0 : index
      %41 = vector.load %arg3[%c0_21, %c0_22] : memref<1x32xf32, #tpu.memory_space<vmem>>, vector<1x32xf32>
      %42 = vector.shape_cast %41 : vector<1x32xf32> to vector<1x1x32xf32>
      %43 = arith.mulf %40, %42 : vector<1x1x32xf32>
      %c0_23 = arith.constant 0 : index
      %c0_24 = arith.constant 0 : index
      %44 = vector.load %arg4[%c0_23, %c0_24] : memref<1x32xf32, #tpu.memory_space<vmem>>, vector<1x32xf32>
      %45 = vector.shape_cast %44 : vector<1x32xf32> to vector<1x1x32xf32>
      %46 = arith.addf %43, %45 : vector<1x1x32xf32>
      %c0_25 = arith.constant 0 : index
      %c0_26 = arith.constant 0 : index
      %c0_27 = arith.constant 0 : index
      %47 = vector.load %arg5[%c0_25, %c0_26, %c0_27] : memref<1x1x32xf32, #tpu.memory_space<vmem>>, vector<1x1x32xf32>
      tpu.vector_store %arg5[%c0_25, %c0_26, %c0_27], %46 {strides = array<i32>} : memref<1x1x32xf32, #tpu.memory_space<vmem>>, vector<1x1x32xf32>,
    } else {
    }
    return
  }
  func.func @transform_0(%arg0: i32, %arg1: i32) -> (i32, i32, i32) {
    %c0_i32 = arith.constant 0 : i32
    %c0_i32_0 = arith.constant 0 : i32
    return %arg0, %arg1, %c0_i32 : i32, i32, i32
  }
  func.func @transform_1(%arg0: i32, %arg1: i32) -> (i32, i32) {
    %c0_i32 = arith.constant 0 : i32
    %c0_i32_0 = arith.constant 0 : i32
    %c0_i32_1 = arith.constant 0 : i32
    return %c0_i32, %c0_i32_0 : i32, i32
  }
  func.func @transform_2(%arg0: i32, %arg1: i32) -> (i32, i32) {
    %c0_i32 = arith.constant 0 : i32
    %c0_i32_0 = arith.constant 0 : i32
    %c0_i32_1 = arith.constant 0 : i32
    return %c0_i32, %c0_i32_0 : i32, i32
  }
  func.func @transform_3(%arg0: i32, %arg1: i32) -> (i32, i32, i32) {
    %c0_i32 = arith.constant 0 : i32
    %c0_i32_0 = arith.constant 0 : i32
    %c0_i32_1 = arith.constant 0 : i32
    return %arg0, %c0_i32, %c0_i32_0 : i32, i32, i32
  }
}

</mosaic_0001>

<bundles_post_ra>
// kernel: tpu_custom_call.1
= control target key start
LH: loop header
LB: loop body
LE: loop exit
PB: predicated region body
PF: predicated region fallthrough
CT: control target
= control target key end

     0   :  { %8 = vsyncpa [#allocation4], 0  ;;  %s1209_s0 = inlined_call_operand.vmem [shape: f32[2,17,32], index: 0, kind: input, shape index: {}]   ;;  %s1210_s1 = inlined_call_operand.vmem [shape: f32[1,32], index: 1, kind: input, shape index: {}]   ;;  %s1211_s2 = inlined_call_operand.vmem [shape: f32[1,32], index: 2, kind: input, shape index: {}]   ;;  %s1212_s3 = inlined_call_operand.hbm [shape: f32[2,1,32], index: 3, kind: output, shape index: {}]  }
   0x1   :  { %10 = vsyncpa [#allocation4 + $0x1], 0  ;;  %s1057_s12 = smov 0   ;;  %s1059_s13 = smov 0  }
   0x2   :  { %s1061_s14 = smov 0   ;;  %s1063_s15 = smov 0  }
   0x3   :  { %s1065_s16 = smov 0   ;;  %s1067_s17 = smov 0  }
   0x4 LB: > { %s805_s18 = sadd.s32 4294967295, %s1032_s17   ;;  %s806_s19 = sadd.s32 4294967294, %s1032_s17   ;;  %s1032_s17 = sphi %s1067_s17, %s16_s17   ;;  %s1028_s16 = sphi %s1065_s16, %s1219_s16   ;;  %s1024_s15 = sphi %s1063_s15, %s1218_s15   ;;  %s1020_s14 = sphi %s1061_s14, %s1217_s14   ;;  %s1016_s13 = sphi %s1059_s13, %s1216_s13   ;;  %s1012_s12 = sphi %s1057_s12, %s1215_s12  }
   0x5   : > { %s28_s20 = sadd.s32 1, %s1028_s16  ;;  %s105_s21 = sadd.s32 1, %s1020_s14 }
   0x6   : > { %p30_p0 = scmp.ge.s32.totalorder %s28_s20, 2  ;;  %p115_p1 = scmp.ne.s32.totalorder %s1020_s14, %s1016_s13 }
   0x7   : > { %p116_p2 = scmp.eq.s32.totalorder %s805_s18, 1  ;;  %p121_p3 = scmp.ne.s32.totalorder %s1016_s13, %s1012_s12 }
   0x8   : > { %s1221_s20 = smov (%p30_p0, %s28_s20), 0  ;;  %p122_p5 = scmp.eq.s32.totalorder %s806_s19, 1 }
   0x9   : > { %p1097_p4 = por %p116_p2, %p115_p1  ;;  %s102_s23 = ssub.s32 %s1028_s16, %s1221_s20 }
   0xa   : > { %p809_p6 = scmp.ge.s32.totalorder %s1032_s17, 1  ;;  %p103_p7 = scmp.eq.s32.totalorder %s102_s23, 0 }
   0xb   : > { %p1104_p8 = por %p122_p5, %p121_p3  ;;  %p159_p9 = scmp.lt.s32.totalorder %s1032_s17, 3 }
   0xc   : > { %s1110_s25 = scalar_select %p103_p7, %s1020_s14, %s105_s21  }
   0xd   : > { %p160_p10 = pnand %p809_p6, %p159_p9 }
   0xe   : > { %p187_p11 = scmp.lt.s32.totalorder (!%p160_p10), %s1024_s15, 1  ;;  %s184_s4 = sand.u32 (!%p160_p10), 1, %s1016_s13  }
   0xf   : > { %163 = sbr.rel (%p160_p10) target bundleno = 584 (0x248), region = 32  ;;  %s815_s9 = sshll.u32 (!%p160_p10), %s1024_s15, 4 }
  0x10   : > { %s185_s10 = scalar_lea.vmem (!%p160_p10), [#allocation3], %s184_s4  ;;  %s734_s21 = scalar_lea.hbm (!%p160_p10), %s1212_s3, %s815_s9 }
  0x11   : > { %s736_s11 = sshll.u32 (!%p160_p10), %s185_s10, 4  ;;  %s724_s23 = scalar_lea.sflag (!%p160_p10), [#allocation4], %s184_s4  ;;  %s737_s11 = int_to_ptr.vmem [resolvable:$true] %s736_s11 }
  0x14   : > { %v206_v0 = vlaneseq  ;;  %v1034_v1 = vmov 0.0   ;;  %s188_s26 = scalar_select %p187_p11, %s1024_s15, 1  ;;  %vm1035_vm0 = vmmov 0   ;;  %vm216_vm3 = vcmask 138240   ;;  %v718_v59 = vld [vmem:[%s1210_s1] sm:$0x1] }
  0x15   : > { %842 = vmatprep.subr.mxu0 %v1034_v1  ;;  %851 = vmatprep.subr.mxu1 %v1034_v1  ;;  %vm220_vm4 = vcmask 1040384   ;;  %vm200_vm6 = vcmask 253952   ;;  %v720_v61 = vld [vmem:[%s1211_s2] sm:$0x1] }
  0x16   : > { %848 = vmatprep.mubr.msk.f32.mxu0 %vm1035_vm0, %v1034_v1  ;;  %v207_v2 = vand.u32 127, %v206_v0  ;;  %857 = vmatprep.mubr.msk.f32.mxu1 %vm1035_vm0, %v1034_v1  ;;  %s896_s27 = smul.u32 24, %s188_s26  ;;  %201 = vst.msk [vmem:[#allocation2] sm:$0x1] %vm200_vm6, %v1034_v1  ;;  %s956_s26 = scalar_lea.vmem %s737_s11, 16 }
  0x17   : > { %p957_p12 = scmp.ne.s32.totalorder %s737_s11, %s956_s26 }
  0x18   : > { %vm210_vm1 = vcmp.ge.s32.totalorder %v207_v2, 1  ;;  %vm211_vm2 = vcmp.lt.s32.totalorder %v207_v2, 17  ;;  %s194_s30 = scalar_lea.vmem %s1209_s0, %s896_s27  ;;  %s1036_s27 = smov [#allocation3]  }
  0x19   : > { %vm212_vm5 = vmand %vm210_vm1, %vm211_vm2  ;;  %v204_v4 = vld [vmem:[%s194_s30 + $0x10] sm:$0x1]  ;;  %v203_v5 = vld [vmem:[%s194_s30 + $0x8] sm:$0xff]  ;;  %p958_p13 = pnand %p957_p12, %p1097_p4  ;;  %s960_s28 = sshll.u32 %s1036_s27, 4  ;;  %s961_s28 = int_to_ptr.vmem [resolvable:$false] %s960_s28 }
  0x1a   : > { %v1124_v3 = vsel %vm212_vm5, 1.0, %v1034_v1  ;;  %v202_v6 = vld [vmem:[%s194_s30] sm:$0xff]  ;;  %v222_v8 = vsel %vm220_vm4, %v204_v4, 0  ;;  %v254_v9 = vand.u32 4294901760, %v203_v5  ;;  %s962_s15 = scalar_lea.vmem %s961_s28, 32  ;;  %p963_p1 = scmp.lt.s32.totalorder %s737_s11, %s961_s28 }
  0x1b   : > { %v218_v7 = vsel %vm216_vm3, %v1124_v3, 0  ;;  %v257_v10 = vand.u32 4294901760, %v202_v6  ;;  %v251_v12 = vand.u32 4294901760, %v222_v8  ;;  %p959_p0 = pneg %p958_p13  ;;  %p964_p2 = scmp.lt.s32.totalorder %s962_s15, %s956_s26 }
  0x1c   : > { %v293_v11 = vsub.f32 %v218_v7, %v218_v7  ;;  %v337_v14 = vsub.f32 %v203_v5, %v254_v9 }
  0x1d   : > { %v344_v15 = vsub.f32 %v202_v6, %v257_v10  ;;  %843 = vmatpush3.msra.mxu0 %v251_v12  ;;  %v330_v16 = vsub.f32 %v222_v8, %v251_v12  ;;  %v215_v42 = vld [vmem:[#allocation2] sm:$0x1]  ;;  %p965_p3 = por %p964_p2, %p963_p1 }
  0x1e   : > { %v294_v13 = vand.u32 4294901760, %v293_v11  ;;  %844 = vmatprep.subr.mxu0 %v1034_v1  ;;  %v338_v18 = vand.u32 4294901760, %v337_v14 }
  0x1f   : > { %v345_v19 = vand.u32 4294901760, %v344_v15  ;;  %845 = vmatpush3.msra.mxu0 %v254_v9  ;;  %v331_v20 = vand.u32 4294901760, %v330_v16  ;;  %p966_p5 = pnand %p965_p3, %p959_p0 }
  0x20   : > { %v295_v17 = vsub.f32 %v293_v11, %v294_v13  ;;  %846 = vmatprep.subr.mxu0 %v1034_v1  ;;  %v339_v22 = vsub.f32 %v337_v14, %v338_v18 }
  0x21   : > { %847 = vmatpush3.msra.mxu0 %v257_v10  ;;  %v332_v23 = vsub.f32 %v330_v16, %v331_v20  ;;  %v346_v24 = vsub.f32 %v344_v15, %v345_v19 }
  0x22   : > { %v296_v21 = vand.u32 4294901760, %v295_v17  ;;  %860 = vmatprep.subr.mxu0 %v1034_v1  ;;  %v340_v26 = vand.u32 4294901760, %v339_v22 }
  0x23   : > { %v333_v25 = vand.u32 4294901760, %v332_v23  ;;  %v347_v27 = vand.u32 4294901760, %v346_v24 }
  0x24   : > { %849 = vmatmul.mubr.f32.vlgmr.msra.gmra.mxu0 %v296_v21 }
  0x25   : > { %861 = vmatpush3.msra.mxu0 %v330_v16  ;;  %866 = vmatprep.mubr.msk.f32.mxu0 %vm1035_vm0, %v1034_v1 }
  0x26   : > { %862 = vmatprep.subr.mxu0 %v1034_v1  ;;  %852 = vmatpush3.msra.mxu1 %v333_v25 }
  0x27   : > { %863 = vmatpush3.msra.mxu0 %v337_v14  ;;  %853 = vmatprep.subr.mxu1 %v1034_v1 }
  0x28   : > { %864 = vmatprep.subr.mxu0 %v1034_v1  ;;  %854 = vmatpush3.msra.mxu1 %v340_v26 }
  0x29   : > { %865 = vmatpush3.msra.mxu0 %v344_v15  ;;  %855 = vmatprep.subr.mxu1 %v1034_v1 }
  0x2a   : > { %867 = vmatmul.mubr.f32.vlgmr.msra.gmra.mxu0 %v293_v11  ;;  %856 = vmatpush3.msra.mxu1 %v347_v27 }
  0x2b   : > { %878 = vmatprep.subr.mxu0 %v1034_v1  ;;  %858 = vmatmul.mubr.msk.f32.vlgmr.msra.gmra.mxu1 %vm216_vm3, %v1124_v3 }
  0x2c   : > { %869 = vmatprep.subr.mxu1 %v1034_v1  ;;  %879 = vmatpush3.msra.mxu0 %v331_v20 }
  0x2d   : > { %870 = vmatpush3.msra.mxu1 %v251_v12  ;;  %880 = vmatprep.subr.mxu0 %v1034_v1 }
  0x2e   : > { %871 = vmatprep.subr.mxu1 %v1034_v1  ;;  %875 = vmatprep.mubr.msk.f32.mxu1 %vm1035_vm0, %v1034_v1 }
  0x2f   : > { %872 = vmatpush3.msra.mxu1 %v254_v9  ;;  %881 = vmatpush3.msra.mxu0 %v338_v18 }
  0x30   : > { %873 = vmatprep.subr.mxu1 %v1034_v1  ;;  %882 = vmatprep.subr.mxu0 %v1034_v1 }
  0x31   : > { %874 = vmatpush3.msra.mxu1 %v257_v10  ;;  %883 = vmatpush3.msra.mxu0 %v345_v19 }
  0x32   : > { %876 = vmatmul.mubr.f32.vlgmr.msra.gmra.mxu1 %v294_v13  ;;  %887 = vmatprep.subr.mxu1 %v1034_v1 }
  0x33   : > { %884 = vmatprep.mubr.msk.f32.mxu0 %vm1035_vm0, %v1034_v1  ;;  %888 = vmatpush3.msra.mxu1 %v251_v12 }
  0x34   : > { %885 = vmatmul.mubr.msk.f32.vlgmr.msra.gmra.mxu0 %vm216_vm3, %v1124_v3  ;;  %889 = vmatprep.subr.mxu1 %v1034_v1 }
  0x35   : > { %893 = vmatprep.mubr.msk.f32.mxu1 %vm1035_vm0, %v1034_v1  ;;  %890 = vmatpush3.msra.mxu1 %v254_v9 }
  0x36   : > { %891 = vmatprep.subr.mxu1 %v1034_v1 }
  0x37   : > { %892 = vmatpush3.msra.mxu1 %v257_v10 }
  0x38   : > { %894 = vmatmul.mubr.msk.f32.vlgmr.msra.gmra.mxu1 %vm216_vm3, %v1124_v3 }
  0xe4   : > { %v298_v28 = vpop.f32.mrf.mxu0 }
  0xe6   : > { %v850_v29 = vpop.f32.mrf.mxu0 }
  0xea   : > { %v462_v30 = vpop.f32.mrf.mxu0 }
  0xeb   : > { %v384_v31 = vpop.f32.mrf.mxu1 }
  0xec   : > { %v868_v32 = vpop.f32.mrf.mxu0  ;;  %v385_v33 = vadd.f32 %v384_v31, %v298_v28 }
  0xed   : > { %v859_v34 = vpop.f32.mrf.mxu1 }
  0xee   : > { %v463_v35 = vadd.f32 %v462_v30, %v385_v33 }
  0xf2   : > { %v538_v36 = vpop.f32.mrf.mxu1 }
  0xf3   : > { %v539_v37 = vadd.f32 %v538_v36, %v463_v35 }
  0xf4   : > { %v877_v38 = vpop.f32.mrf.mxu1  ;;  %v618_v39 = vpop.f32.mrf.mxu0 }
  0xf5   : > { %v619_v41 = vadd.f32 %v618_v39, %v539_v37 }
  0xf6   : > { %v886_v40 = vpop.f32.mrf.mxu0 }
  0xf8   : > { %v692_v43 = vpop.f32.mrf.mxu1 }
  0xf9   : > { %v693_v44 = vadd.f32 %v692_v43, %v619_v41 }
  0xfa   : > { %v895_v45 = vpop.f32.mrf.mxu1 }
  0xfb   : > { %v696_v46 = vadd.f32 %v693_v44, %v215_v42 }
  0xfd   : > { %698 = vst.msk [vmem:[#allocation2] sm:$0x1] %vm200_vm6, %v696_v46 }
 0x104   : > { %v702_v47 = vld [vmem:[#allocation2] sm:$0x1] }
 0x105   : > { %v703_v48 = vmul.f32 0.0625, %v702_v47 }
 0x107   : > { %v704_v49 = vsel %vm200_vm6, %v703_v48, 0.0 }
 0x108   : > { %705 = vadd.xlane.f32.xlu0 %v704_v49 }
 0x191   : > { %v706_v50 = vpop.xlane.xlu0 %705 }
 0x192   : > { %v708_v51 = vmul.f32 0.03125, %v706_v50 }
 0x194   : > { %v709_v52 = vsub.f32 %v703_v48, %v708_v51 }
 0x196   : > { %v710_v53 = vmul.f32 %v709_v52, %v709_v52 }
 0x198   : > { %v711_v54 = vsel %vm200_vm6, %v710_v53, 0.0 }
 0x199   : > { %712 = vadd.xlane.f32.xlu0 %v711_v54 }
 0x222   : > { %v713_v55 = vpop.xlane.xlu0 %712 }
 0x223   : > { %v714_v56 = vmul.f32 0.03125, %v713_v55 }
 0x225   : > { %v715_v57 = vadd.f32 1e-12, %v714_v56 }
 0x227   : > { %954 = vrsqrt.f32 %v715_v57 }
 0x234   : > { %v955_v58 = vpop.eup %954 }
 0x235   : > { %v717_v60 = vmul.f32 %v955_v58, %v709_v52 }
 0x237   : > { %v719_v62 = vmul.f32 %v718_v59, %v717_v60 }
 0x239   : > { %v721_v63 = vadd.f32 %v720_v61, %v719_v62 }
 0x23b   : > { %722 = vst.msk [vmem:[%s185_s10] sm:$0x1] %vm200_vm6, %v721_v63 }
 0x23c   : > { %969 = shalt.err (!%p966_p5)
}
 0x23d   : > { %s970_s29 = scalar_lea.hbm %s734_s21, 16  ;;  %s974_s5 = scalar_lea.hbm %s1212_s3, 32 }
 0x23e   : > { %p971_p6 = scmp.ne.s32.totalorder %s734_s21, %s970_s29  ;;  %p975_p10 = scmp.lt.s32.totalorder %s734_s21, %s1212_s3 }
 0x23f   : > { %p976_p11 = scmp.lt.s32.totalorder %s974_s5, %s970_s29 }
 0x240   : > { %p972_p7 = pnand %p971_p6, %p1097_p4 }
 0x241   : > { %p977_p12 = por %p976_p11, %p975_p10 }
 0x242   : > { %p973_p9 = pneg %p972_p7 }
 0x244   : > { %p978_p13 = pnand %p977_p12, %p973_p9 }
 0x246   : > { %981 = shalt.err (!%p978_p13)
}
 0x247   : > { %897 = dma.vmem_to_hbm [thread:$0]  (%p1097_p4), %s737_s11, 16, %s734_s21, %s724_s23  }
 0x248 PF: > { %p903_p0 = scmp.ge.s32.totalorder %s1032_s17, 2  ;;  %s748_s8 = sand.u32 1, %s1012_s12  }
 0x249   : > { %s749_s9 = scalar_lea.sflag [#allocation4], %s748_s8 }
 0x24a   : > { %p900_p1 = pnand %p903_p0, %p1104_p8 }
 0x24c   : > { %p901_p2 = pneg %p900_p1 }
 0x24e   : > { %1007 = dma.done.wait (%p901_p2), %s749_s9, 16  }
 0x24f   : > { %1009 = vsyncadd (%p901_p2), %s749_s9, 4294967280  ;;  %s16_s17 = sadd.s32 1, %s1032_s17   ;;  %s1215_s12 = smov %s1016_s13 }
 0x250   : > { %p13_p3 = scmp.ge.s32.totalorder %s16_s17, 4   ;;  %s1216_s13 = smov %s1020_s14 }
 0x251   : > { %s1217_s14 = smov %s1110_s25  ;;  %s1218_s15 = smov %s1028_s16 }
 0x252   : > { %s1219_s16 = smov %s1221_s20  ;;  %15 = sbr.rel (!%p13_p3) target bundleno = 4 (0x4), region = 75 }
 0x257   :  { %753 = vsyncpa [#allocation4], 1 }
 0x258   :  { %755 = vsyncpa [#allocation4 + $0x1], 1 }

</bundles_post_ra>
